<compile_context>
chip_gen: v6e
topology: v6e:2x2x1
jax: 0.10.0
libtpu: 0.0.40
codegen_flags: <defaults>
</compile_context>

<pallas_src>
import functools

import jax
import jax.numpy as jnp
import numpy as np
from jax.experimental import pallas as pl
from jax.experimental.pallas import tpu as pltpu

BN_EPS = 1e-5
PLANES = [32, 64, 128, 256, 512]

LINEAR_TILE = 512   # point tile for standalone linear layers (MXU M dimension)
KNN_TILE = 256      # point tile shared by the fine-side linear and the kNN kernel
                    # (kept moderate so the resident coarse blocks + (tile, M) scratch
                    #  stay comfortably inside v7x's 64 MiB VMEM)


def _round_up(x, m):
    return ((x + m - 1) // m) * m


# --------------------------------------------------------------------------------------
# Kernel 1: fused  y = relu( x @ W' + t' )   (BN already folded into W', t')
# --------------------------------------------------------------------------------------
def _linear_bn_relu_kernel(x_ref, w_ref, t_ref, o_ref, *, relu):
    x = x_ref[...].astype(jnp.bfloat16)                       # bf16 MXU inputs
    y = jnp.dot(x, w_ref[...], preferred_element_type=jnp.float32)
    y = y + t_ref[...]
    if relu:
        y = jnp.maximum(y, 0.0)
    o_ref[...] = y                                            # f32 out


def fused_linear_bn_relu(x, w_bf16, t, relu=True, tile_n=LINEAR_TILE,
                         n_pad=None, trim=True):
    n, cin = x.shape
    cout = w_bf16.shape[1]
    tile_n = min(tile_n, _round_up(n, 8))
    if n_pad is None:
        n_pad = _round_up(n, tile_n)
    assert n_pad % tile_n == 0
    xp = jnp.pad(x, ((0, n_pad - n), (0, 0))) if n_pad > n else x
    # TODO(synk): for cout in {32, 64} the (tile_n, cout) out_spec still produces masked
    # partial stores; lane-padding the weight/output to 128 was not implemented.
    out = pl.pallas_call(
        functools.partial(_linear_bn_relu_kernel, relu=relu),
        out_shape=jax.ShapeDtypeStruct((n_pad, cout), jnp.float32),
        grid=(n_pad // tile_n,),
        in_specs=[
            pl.BlockSpec((tile_n, cin), lambda i: (i, 0)),
            pl.BlockSpec((cin, cout), lambda i: (0, 0)),
            pl.BlockSpec((1, cout), lambda i: (0, 0)),
        ],
        out_specs=pl.BlockSpec((tile_n, cout), lambda i: (i, 0)),
        compiler_params=pltpu.CompilerParams(dimension_semantics=("parallel",)),
    )(xp, w_bf16, t)
    return out[:n] if trim else out


# --------------------------------------------------------------------------------------
# Kernel 2: confidence head  conf = (relu(x @ W1' + t1')) @ w2 + b2,  cout(w2) == 1
#           The 32->1 layer is a VPU row-reduction fused into the 32->32 kernel.
# --------------------------------------------------------------------------------------
def _confidence_kernel(x_ref, w1_ref, t1_ref, w2_ref, b2_ref, o_ref):
    x = x_ref[...].astype(jnp.bfloat16)
    h = jnp.dot(x, w1_ref[...], preferred_element_type=jnp.float32) + t1_ref[...]
    h = jnp.maximum(h, 0.0)
    conf = jnp.sum(h * w2_ref[...], axis=1, keepdims=True) + b2_ref[...]
    o_ref[...] = conf


def confidence_head(x, w1_bf16, t1, w2t, b2, tile_n=LINEAR_TILE):
    n, cin = x.shape
    tile_n = min(tile_n, _round_up(n, 8))
    n_pad = _round_up(n, tile_n)
    xp = jnp.pad(x, ((0, n_pad - n), (0, 0))) if n_pad > n else x
    out = pl.pallas_call(
        _confidence_kernel,
        out_shape=jax.ShapeDtypeStruct((n_pad, 1), jnp.float32),
        grid=(n_pad // tile_n,),
        in_specs=[
            pl.BlockSpec((tile_n, cin), lambda i: (i, 0)),
            pl.BlockSpec((cin, cin), lambda i: (0, 0)),
            pl.BlockSpec((1, cin), lambda i: (0, 0)),
            pl.BlockSpec((1, cin), lambda i: (0, 0)),
            pl.BlockSpec((1, 1), lambda i: (0, 0)),
        ],
        out_specs=pl.BlockSpec((tile_n, 1), lambda i: (i, 0)),
        compiler_params=pltpu.CompilerParams(dimension_semantics=("parallel",)),
    )(xp, w1_bf16, t1, w2t, b2)
    return out[:n]


# --------------------------------------------------------------------------------------
# Kernel 3: base + pointops.interpolation(p_coarse, p_fine, feat_coarse, o_coarse, o_fine)
#           k = 3 nearest neighbours per fine point (within its batch), inverse-distance
#           weighted feature average.  Tiled over fine points; coarse blocks resident.
# --------------------------------------------------------------------------------------
def _knn_interp_add_kernel(pf_ref, pct_ref, feat_ref, bidf_ref, bidc_ref,
                           base_ref, o_ref):
    pf = pf_ref[...]            # (T, 3)  fine coords (tile)
    pct = pct_ref[...]          # (3, M)  coarse coords (resident, pre-transposed)
    m = pct.shape[1]

    # Exact pairwise squared distances on the VPU.  The |a|^2+|b|^2-2ab MXU
    # formulation was evaluated and rejected: catastrophic cancellation destroys the
    # d==0 self-interpolation case (dec5 interpolates p5 -> p5), perturbing the
    # 1/(d+1e-8) weights by ~1e5x and breaking the module's semantics.
    d0 = pf[:, 0:1] - pct[0:1, :]
    d1 = pf[:, 1:2] - pct[1:2, :]
    d2c = pf[:, 2:3] - pct[2:3, :]
    d2 = d0 * d0 + d1 * d1 + d2c * d2c

    big = jnp.float32(1e30)
    d2 = jnp.where(bidf_ref[...] == bidc_ref[...], d2, big)   # int32 batch masking

    iota = jax.lax.broadcasted_iota(jnp.float32, d2.shape, 1)
    m_f = jnp.float32(m)
    wmat = jnp.zeros(d2.shape, jnp.float32)
    rsum = jnp.zeros((d2.shape[0], 1), jnp.float32)
    # 3 nearest neighbours, unrolled.  2 lane reductions / neighbour; the selection
    # mask `sel` is computed once and reused for both the weight update and the
    # exclusion of the chosen column.
    for _ in range(3):
        dmin = jnp.min(d2, axis=1, keepdims=True)
        cand = jnp.where(d2 <= dmin, iota, m_f)
        idx = jnp.min(cand, axis=1, keepdims=True)             # first index attaining min
        sel = cand == idx
        recip = 1.0 / (jnp.sqrt(dmin) + 1e-8)
        wmat = wmat + jnp.where(sel, recip, 0.0)
        rsum = rsum + recip
        d2 = jnp.where(sel, big, d2)
    wmat = wmat * (1.0 / rsum)                                 # (T,1) exact reciprocal

    o_ref[...] = base_ref[...] + jnp.dot(
        wmat, feat_ref[...], preferred_element_type=jnp.float32)


def knn_interpolation_add(p_coarse, p_fine, feat_coarse, o_coarse, o_fine, base,
                          tile_f, n_pad):
    # TODO(synk): assumes every batch has >= 3 coarse points (the CUDA knnquery
    # degenerate-batch padding behaviour is not reproduced).
    n = p_fine.shape[0]
    m, c = feat_coarse.shape
    assert base.shape[0] == n_pad and n_pad % tile_f == 0

    pf = jnp.pad(p_fine, ((0, n_pad - n), (0, 0))) if n_pad > n else p_fine
    # padded fine rows get batch id == B (searchsorted past the last offset), which
    # never matches a coarse batch id in [0, B-1] -> masked out, sliced off by caller.
    bidf = jnp.searchsorted(o_fine, jnp.arange(n_pad, dtype=jnp.int32),
                            side="right").astype(jnp.int32).reshape(n_pad, 1)
    bidc = jnp.searchsorted(o_coarse, jnp.arange(m, dtype=jnp.int32),
                            side="right").astype(jnp.int32).reshape(1, m)
    pct = p_coarse.T  # (3, M)

    return pl.pallas_call(
        _knn_interp_add_kernel,
        out_shape=jax.ShapeDtypeStruct((n_pad, c), jnp.float32),
        grid=(n_pad // tile_f,),
        in_specs=[
            pl.BlockSpec((tile_f, 3), lambda i: (i, 0)),   # fine coords   (tiled)
            pl.BlockSpec((3, m), lambda i: (0, 0)),        # coarse coords (resident)
            pl.BlockSpec((m, c), lambda i: (0, 0)),        # coarse feats  (resident)
            pl.BlockSpec((tile_f, 1), lambda i: (i, 0)),   # fine batch id (tiled)
            pl.BlockSpec((1, m), lambda i: (0, 0)),        # coarse batch id (resident)
            pl.BlockSpec((tile_f, c), lambda i: (i, 0)),   # residual base (tiled)
        ],
        out_specs=pl.BlockSpec((tile_f, c), lambda i: (i, 0)),
        compiler_params=pltpu.CompilerParams(
            dimension_semantics=("parallel",),
            vmem_limit_bytes=48 * 1024 * 1024,   # above v5e's 16 MiB default, below v7x physical
        ),
    )(pf, pct, feat_coarse, bidf, bidc, base)


# --------------------------------------------------------------------------------------
# TransitionUp (two-argument branch) and the PTRecognizer forward
# --------------------------------------------------------------------------------------
def transition_up_fwd(pxo1, pxo2, prm):
    p1, x1, o1 = pxo1   # fine level
    p2, x2, o2 = pxo2   # coarse level
    n = x1.shape[0]
    tile_f = min(KNN_TILE, _round_up(n, 8))
    n_pad = _round_up(n, tile_f)
    # fine-side linear output stays padded and feeds the kNN kernel directly as the
    # residual base (no slice + re-pad HBM round trip between the two kernels).
    a_pad = fused_linear_bn_relu(x1, prm["w1"], prm["t1"], relu=True,
                                 tile_n=tile_f, n_pad=n_pad, trim=False)
    f2 = fused_linear_bn_relu(x2, prm["w2"], prm["t2"], relu=True,
                              tile_n=LINEAR_TILE)
    r_pad = knn_interpolation_add(p2, p1, f2, o2, o1, a_pad,
                                  tile_f=tile_f, n_pad=n_pad)
    return r_pad[:n]


def pt_recognizer_forward(model_hooks, pparams):
    p1, _, o1 = model_hooks["backbone.enc1"]["forward_output"]
    p2, _, o2 = model_hooks["backbone.enc2"]["forward_output"]
    p3, _, o3 = model_hooks["backbone.enc3"]["forward_output"]
    p4, _, o4 = model_hooks["backbone.enc4"]["forward_output"]
    p5, x5_enc, o5 = model_hooks["backbone.enc5"]["forward_output"]
    x5_dec = model_hooks["backbone.dec5.1"]["forward_output"][1]
    x4 = model_hooks["backbone.dec4.1"]["forward_output"][1]
    x3 = model_hooks["backbone.dec3.1"]["forward_output"][1]
    x2 = model_hooks["backbone.dec2.1"]["forward_output"][1]
    x1 = model_hooks["backbone.dec1.1"]["forward_output"][1]

    r5 = transition_up_fwd((p5, x5_dec, o5), (p5, x5_enc, o5), pparams["dec5"])
    r4 = transition_up_fwd((p4, x4, o4), (p5, r5, o5), pparams["dec4"])
    r3 = transition_up_fwd((p3, x3, o3), (p4, r4, o4), pparams["dec3"])
    r2 = transition_up_fwd((p2, x2, o2), (p3, r3, o3), pparams["dec2"])
    r1 = transition_up_fwd((p1, x1, o1), (p2, r2, o2), pparams["dec1"])

    cp = pparams["conf"]
    return confidence_head(r1, cp["w1"], cp["t1"], cp["w2t"], cp["b2"])


# --------------------------------------------------------------------------------------
# Deterministic raw parameter construction + inference-time preparation
# (BN folded to eval-mode scale/shift, then folded into the Linear; weights -> bf16)
# --------------------------------------------------------------------------------------
def make_params(key):
    # TODO(synk): training-mode BatchNorm (batch statistics) is not modeled; BN is
    # eval-mode with deterministically generated affine params / running stats.
    keys = list(jax.random.split(key, 80))
    it = iter(keys)

    def nk():
        return next(it)

    def linear(cin, cout):
        w = jax.random.normal(nk(), (cin, cout), jnp.float32) * (1.0 / np.sqrt(cin))
        b = 0.02 * jax.random.normal(nk(), (cout,), jnp.float32)
        return w, b

    def bn(c):
        gamma = 1.0 + 0.05 * jax.random.normal(nk(), (c,), jnp.float32)
        beta = 0.02 * jax.random.normal(nk(), (c,), jnp.float32)
        mean = 0.02 * jax.random.normal(nk(), (c,), jnp.float32)
        var = 1.0 + 0.1 * jnp.abs(jax.random.normal(nk(), (c,), jnp.float32))
        scale = gamma / jnp.sqrt(var + BN_EPS)
        shift = beta - mean * scale
        return scale, shift

    def transition_up(cin, cout):
        w1, b1 = linear(cout, cout)
        s1, t1 = bn(cout)
        w2, b2 = linear(cin, cout)
        s2, t2 = bn(cout)
        return dict(w1=w1, b1=b1, s1=s1, t1=t1, w2=w2, b2=b2, s2=s2, t2=t2)

    params = dict(
        dec5=transition_up(PLANES[4], PLANES[4]),
        dec4=transition_up(PLANES[4], PLANES[3]),
        dec3=transition_up(PLANES[3], PLANES[2]),
        dec2=transition_up(PLANES[2], PLANES[1]),
        dec1=transition_up(PLANES[1], PLANES[0]),
    )
    wc1, bc1 = linear(PLANES[0], PLANES[0])
    sc1, tc1 = bn(PLANES[0])
    wc2, bc2 = linear(PLANES[0], 1)
    params["conf"] = dict(w1=wc1, b1=bc1, s1=sc1, t1=tc1, w2=wc2, b2=bc2)
    return params


def prepare_inference_params(raw):
    """Fold eval-mode BN into the preceding Linear and cast weights to bf16 (once)."""
    def fold(w, b, s, t):
        wf = (w * s[None, :]).astype(jnp.bfloat16)
        tf = (b * s + t).reshape(1, -1).astype(jnp.float32)
        return wf, tf

    out = {}
    for k, prm in raw.items():
        if not k.startswith("dec"):
            continue
        w1, t1 = fold(prm["w1"], prm["b1"], prm["s1"], prm["t1"])
        w2, t2 = fold(prm["w2"], prm["b2"], prm["s2"], prm["t2"])
        out[k] = dict(w1=w1, t1=t1, w2=w2, t2=t2)

    cp = raw["conf"]
    w1, t1 = fold(cp["w1"], cp["b1"], cp["s1"], cp["t1"])
    out["conf"] = dict(
        w1=w1, t1=t1,
        w2t=cp["w2"].T.astype(jnp.float32),          # (1, 32) row for the VPU reduction
        b2=cp["b2"].reshape(1, 1).astype(jnp.float32),
    )
    return out


# --------------------------------------------------------------------------------------
# Pure-JAX (non-Pallas) reference for correctness checking (same bf16/folded-BN numerics)
# --------------------------------------------------------------------------------------
def _batch_ids(offsets, n):
    return jnp.searchsorted(offsets, jnp.arange(n, dtype=jnp.int32),
                            side="right").astype(jnp.int32)


def _ref_linear_bn_relu(x, w_bf16, t, relu=True):
    y = jnp.dot(x.astype(jnp.bfloat16), w_bf16,
                preferred_element_type=jnp.float32) + t
    return jnp.maximum(y, 0.0) if relu else y


def _ref_knn_interp_add(p_coarse, p_fine, feat, o_c, o_f, base):
    n, m = p_fine.shape[0], p_coarse.shape[0]
    bidf = _batch_ids(o_f, n).reshape(n, 1)
    bidc = _batch_ids(o_c, m).reshape(1, m)
    d2 = jnp.sum((p_fine[:, None, :] - p_coarse[None, :, :]) ** 2, axis=-1)
    big = jnp.float32(1e30)
    d2 = jnp.where(bidf == bidc, d2, big)
    iota = jnp.broadcast_to(jnp.arange(m, dtype=jnp.float32)[None, :], (n, m))
    wmat = jnp.zeros((n, m), jnp.float32)
    rsum = jnp.zeros((n, 1), jnp.float32)
    for _ in range(3):
        dmin = jnp.min(d2, axis=1, keepdims=True)
        cand = jnp.where(d2 <= dmin, iota, jnp.float32(m))
        idx = jnp.min(cand, axis=1, keepdims=True)
        sel = cand == idx
        recip = 1.0 / (jnp.sqrt(dmin) + 1e-8)
        wmat = wmat + jnp.where(sel, recip, 0.0)
        rsum = rsum + recip
        d2 = jnp.where(sel, big, d2)
    return base + (wmat / rsum) @ feat


def _ref_transition_up(pxo1, pxo2, prm):
    p1, x1, o1 = pxo1
    p2, x2, o2 = pxo2
    a = _ref_linear_bn_relu(x1, prm["w1"], prm["t1"], True)
    f2 = _ref_linear_bn_relu(x2, prm["w2"], prm["t2"], True)
    return _ref_knn_interp_add(p2, p1, f2, o2, o1, a)


def _ref_forward(model_hooks, pparams):
    p1, _, o1 = model_hooks["backbone.enc1"]["forward_output"]
    p2, _, o2 = model_hooks["backbone.enc2"]["forward_output"]
    p3, _, o3 = model_hooks["backbone.enc3"]["forward_output"]
    p4, _, o4 = model_hooks["backbone.enc4"]["forward_output"]
    p5, x5_enc, o5 = model_hooks["backbone.enc5"]["forward_output"]
    x5_dec = model_hooks["backbone.dec5.1"]["forward_output"][1]
    x4 = model_hooks["backbone.dec4.1"]["forward_output"][1]
    x3 = model_hooks["backbone.dec3.1"]["forward_output"][1]
    x2 = model_hooks["backbone.dec2.1"]["forward_output"][1]
    x1 = model_hooks["backbone.dec1.1"]["forward_output"][1]
    r5 = _ref_transition_up((p5, x5_dec, o5), (p5, x5_enc, o5), pparams["dec5"])
    r4 = _ref_transition_up((p4, x4, o4), (p5, r5, o5), pparams["dec4"])
    r3 = _ref_transition_up((p3, x3, o3), (p4, r4, o4), pparams["dec3"])
    r2 = _ref_transition_up((p2, x2, o2), (p3, r3, o3), pparams["dec2"])
    r1 = _ref_transition_up((p1, x1, o1), (p2, r2, o2), pparams["dec1"])
    cp = pparams["conf"]
    h = _ref_linear_bn_relu(r1, cp["w1"], cp["t1"], True)
    return h @ cp["w2t"].T + cp["b2"]


# --------------------------------------------------------------------------------------
if __name__ == "__main__":
    key = jax.random.PRNGKey(0)
    k_pts, k_feat, k_par = jax.random.split(key, 3)

    # small synthetic PointTransformer pyramid: batch=2, counts halve per level
    counts = [128, 64, 32, 16, 8]          # n1..n5 total points (2 batches, equal split)
    pk = jax.random.split(k_pts, 5)
    fk = jax.random.split(k_feat, 6)

    ps, xs, os_ = [], [], []
    for lvl in range(5):
        n = counts[lvl]
        ps.append(jax.random.normal(pk[lvl], (n, 3), jnp.float32))
        xs.append(jax.random.normal(fk[lvl], (n, PLANES[lvl]), jnp.float32))
        os_.append(jnp.array([n // 2, n], dtype=jnp.int32))
    x5_enc = jax.random.normal(fk[5], (counts[4], PLANES[4]), jnp.float32)

    model_hooks = {
        "backbone.enc1": {"forward_output": (ps[0], None, os_[0])},
        "backbone.enc2": {"forward_output": (ps[1], None, os_[1])},
        "backbone.enc3": {"forward_output": (ps[2], None, os_[2])},
        "backbone.enc4": {"forward_output": (ps[3], None, os_[3])},
        "backbone.enc5": {"forward_output": (ps[4], x5_enc, os_[4])},
        "backbone.dec5.1": {"forward_output": (None, xs[4], None)},
        "backbone.dec4.1": {"forward_output": (None, xs[3], None)},
        "backbone.dec3.1": {"forward_output": (None, xs[2], None)},
        "backbone.dec2.1": {"forward_output": (None, xs[1], None)},
        "backbone.dec1.1": {"forward_output": (None, xs[0], None)},
    }

    raw_params = make_params(k_par)
    pparams = prepare_inference_params(raw_params)

    conf = pt_recognizer_forward(model_hooks, pparams)
    conf = jax.block_until_ready(conf)
    assert conf.shape == (counts[0], 1)

    ref = _ref_forward(model_hooks, pparams)
    np.testing.assert_allclose(np.asarray(conf), np.asarray(ref), rtol=2e-3, atol=2e-3)

    print("KERNEL_OK")
</pallas_src>

<mosaic_0001>
module attributes {stable_mosaic.version = 11 : i64} {
  func.func @_linear_bn_relu_kernel(%arg0: i32, %arg1: memref<8x512xf32, #tpu.memory_space<vmem>>, %arg2: memref<512x512xbf16, #tpu.memory_space<vmem>>, %arg3: memref<1x512xf32, #tpu.memory_space<vmem>>, %arg4: memref<8x512xf32, #tpu.memory_space<vmem>>) attributes {dimension_semantics = [#tpu.dimension_semantics<parallel>], iteration_bounds = array<i64: 1>, scalar_prefetch = 0 : i64, scratch_operands = 0 : i64, tpu.core_type = #tpu.core_type<tc>, window_params = [{transform_indices = @transform_0, window_bounds = array<i64: 8, 512>}, {pipeline_mode = #tpu.pipeline_mode<synchronous>, transform_indices = @transform_1, window_bounds = array<i64: 512, 512>}, {pipeline_mode = #tpu.pipeline_mode<synchronous>, transform_indices = @transform_2, window_bounds = array<i64: 1, 512>}, {transform_indices = @transform_3, window_bounds = array<i64: 8, 512>}]} {
    %c0 = arith.constant 0 : index
    %c0_0 = arith.constant 0 : index
    %0 = vector.load %arg1[%c0, %c0_0] : memref<8x512xf32, #tpu.memory_space<vmem>>, vector<8x512xf32>
    %1 = arith.truncf %0 : vector<8x512xf32> to vector<8x512xbf16>
    %c0_1 = arith.constant 0 : index
    %c0_2 = arith.constant 0 : index
    %2 = vector.load %arg2[%c0_1, %c0_2] : memref<512x512xbf16, #tpu.memory_space<vmem>>, vector<512x512xbf16>
    %cst = arith.constant dense<0.000000e+00> : vector<8x512xf32>
    %3 = tpu.matmul %1, %2, %cst {dimension_numbers = #tpu.dot_dimension_numbers<[1], [0], [0], [1], [0, 0, 1, 1], [], []>} : vector<8x512xbf16>, vector<512x512xbf16>, vector<8x512xf32> -> vector<8x512xf32>
    %c0_3 = arith.constant 0 : index
    %c0_4 = arith.constant 0 : index
    %4 = vector.load %arg3[%c0_3, %c0_4] : memref<1x512xf32, #tpu.memory_space<vmem>>, vector<1x512xf32>
    %5 = vector.broadcast %4 : vector<1x512xf32> to vector<8x512xf32>
    %6 = arith.addf %3, %5 : vector<8x512xf32>
    %cst_5 = arith.constant 0.000000e+00 : f32
    %7 = vector.broadcast %cst_5 : f32 to vector<8x512xf32>
    %8 = arith.maximumf %6, %7 : vector<8x512xf32>
    %c0_6 = arith.constant 0 : index
    %c0_7 = arith.constant 0 : index
    %9 = vector.load %arg4[%c0_6, %c0_7] : memref<8x512xf32, #tpu.memory_space<vmem>>, vector<8x512xf32>
    tpu.vector_store %arg4[%c0_6, %c0_7], %8 {strides = array<i32>} : memref<8x512xf32, #tpu.memory_space<vmem>>, vector<8x512xf32>,
    return
  }
  func.func @transform_0(%arg0: i32) -> (i32, i32) {
    %c0_i32 = arith.constant 0 : i32
    %c0_i32_0 = arith.constant 0 : i32
    return %arg0, %c0_i32 : i32, i32
  }
  func.func @transform_1(%arg0: i32) -> (i32, i32) {
    %c0_i32 = arith.constant 0 : i32
    %c0_i32_0 = arith.constant 0 : i32
    %c0_i32_1 = arith.constant 0 : i32
    return %c0_i32, %c0_i32_0 : i32, i32
  }
  func.func @transform_2(%arg0: i32) -> (i32, i32) {
    %c0_i32 = arith.constant 0 : i32
    %c0_i32_0 = arith.constant 0 : i32
    %c0_i32_1 = arith.constant 0 : i32
    return %c0_i32, %c0_i32_0 : i32, i32
  }
  func.func @transform_3(%arg0: i32) -> (i32, i32) {
    %c0_i32 = arith.constant 0 : i32
    %c0_i32_0 = arith.constant 0 : i32
    return %arg0, %c0_i32 : i32, i32
  }
}

</mosaic_0001>

<bundles_post_ra>
// kernel: tpu_custom_call.1
= control target key start
LH: loop header
LB: loop body
LE: loop exit
PB: predicated region body
PF: predicated region fallthrough
CT: control target
= control target key end

     0   :  { %8 = vsyncpa [#allocation3], 0  ;;  %s1500_s0 = inlined_call_operand.hbm [shape: f32[8,512], index: 0, kind: input, shape index: {}]   ;;  %s1501_s1 = inlined_call_operand.hbm [shape: bf16[512,512], index: 1, kind: input, shape index: {}]   ;;  %s1502_s2 = inlined_call_operand.hbm [shape: f32[1,512], index: 2, kind: input, shape index: {}]   ;;  %s1503_s3 = inlined_call_operand.hbm [shape: f32[8,512], index: 3, kind: output, shape index: {}]  }
   0x1   :  { %9 = vsyncpa [#allocation6], 0 }
   0x2   :  { %10 = vsyncpa [#allocation4], 0  ;;  %s1450_s12 = smov [#allocation5]  }
   0x3   :  { %s26_s13 = sshll.u32 %s1450_s12, 4  ;;  %s27_s13 = int_to_ptr.vmem [resolvable:$true] %s26_s13 }
   0x4   :  { %s1372_s14 = scalar_lea.vmem %s27_s13, 16384  ;;  %p1377_p1 = scmp.lt.s32.totalorder %s27_s13, %s27_s13 }
   0x5   :  { %p1373_p0 = scmp.ne.s32.totalorder %s27_s13, %s1372_s14  ;;  %p1378_p2 = scmp.lt.s32.totalorder %s1372_s14, %s1372_s14 }
   0x7   :  { %p1379_p3 = por %p1378_p2, %p1377_p1 }
   0x9   :  { %p1380_p4 = pnand %p1379_p3, %p1373_p0 }
   0xb   :  { %1383 = shalt.err (!%p1380_p4)
}
   0xc   :  { %s1451_s15 = smov 256   ;;  %s1452_s16 = smov 16  }
   0xd   :  { %32 = dma.hbm_to_vmem [thread:$0]  %s1501_s1, 16384, %s27_s13, [#allocation6], %s1451_s15, %s1451_s15, %s1452_s16  }
   0xe   :  { %s1453_s19 = smov [#allocation2]   ;;  %s1454_s21 = smov [#allocation7]  }
   0xf   :  { %s17_s20 = sshll.u32 %s1453_s19, 4  ;;  %s39_s22 = sshll.u32 %s1454_s21, 4  ;;  %s18_s20 = int_to_ptr.vmem [resolvable:$true] %s17_s20  ;;  %s40_s22 = int_to_ptr.vmem [resolvable:$true] %s39_s22 }
  0x10   :  { %s1392_s23 = scalar_lea.vmem %s18_s20, 512  ;;  %p1397_p6 = scmp.lt.s32.totalorder %s18_s20, %s18_s20 }
  0x11   :  { %p1393_p5 = scmp.ne.s32.totalorder %s18_s20, %s1392_s23  ;;  %p1398_p7 = scmp.lt.s32.totalorder %s1392_s23, %s1392_s23 }
  0x13   :  { %p1399_p8 = por %p1398_p7, %p1397_p6 }
  0x15   :  { %p1400_p9 = pnand %p1399_p8, %p1393_p5 }
  0x17   :  { %1403 = shalt.err (!%p1400_p9)
}
  0x18   :  { %20 = dma.hbm_to_vmem [thread:$0]  %s1500_s0, 512, %s18_s20, [#allocation3]  }
  0x19   :  { %s1412_s26 = scalar_lea.vmem %s40_s22, 64  ;;  %p1417_p11 = scmp.lt.s32.totalorder %s40_s22, %s40_s22 }
  0x1a   :  { %p1413_p10 = scmp.ne.s32.totalorder %s40_s22, %s1412_s26  ;;  %p1418_p12 = scmp.lt.s32.totalorder %s1412_s26, %s1412_s26 }
  0x1c   :  { %p1419_p13 = por %p1418_p12, %p1417_p11 }
  0x1e   :  { %p1420_p0 = pnand %p1419_p13, %p1413_p10 }
  0x20   :  { %1423 = shalt.err (!%p1420_p0)
}
  0x21   :  { %42 = dma.hbm_to_vmem [thread:$0]  %s1502_s2, 64, %s40_s22, [#allocation6]  }
  0x22   :  { %1444 = dma.done.wait [#allocation3], 512  }
  0x23   :  { %1445 = vsyncadd [#allocation3], 4294966784 }
  0x24   :  { %1446 = dma.done.wait [#allocation6], 16448  }
  0x25   :  { %1447 = vsyncadd [#allocation6], 4294950848  ;;  %v1172_v0 = vld [vmem:[#allocation5 + $0xe4] ss:$16 sps:$4 sm:$0xff]   ;;  %v1176_v2 = vld [vmem:[#allocation5 + $0xe0] ss:$16 sps:$4 sm:$0xff]  }
  0x26   :  { %v1174_v1 = vld [vmem:[#allocation5 + $0x2e4] ss:$16 sps:$4 sm:$0xff]   ;;  %850 = vmatprep.subr.bf16.mxu0 %v1172_v0  ;;  %v1177_v3 = vld [vmem:[#allocation5 + $0x2e0] ss:$16 sps:$4 sm:$0xff]   ;;  %v53_v46 = vld [vmem:[#allocation2 + $0x8] sm:$0xff]  ;;  %s1455_s0 = smov [#allocation8]  }
  0x27   :  { %891 = vmatprep.subr.bf16.mxu1 %v1174_v1  ;;  %v1178_v4 = vld [vmem:[#allocation5 + $0xc4] ss:$16 sps:$4 sm:$0xff]   ;;  %851 = vmatpush1.bf16.msra.mxu0 %v1176_v2  ;;  %v1182_v6 = vld [vmem:[#allocation5 + $0xc0] ss:$16 sps:$4 sm:$0xff]   ;;  %v1485_v49 = vpack.c.bf16 %v53_v46, %v53_v46  ;;  %v55_v50 = vld [vmem:[#allocation2 + $0x18] sm:$0xff]  ;;  %s1028_s2 = sshll.u32 %s1455_s0, 4  ;;  %s1029_s2 = int_to_ptr.vmem [resolvable:$true] %s1028_s2 }
  0x28   :  { %892 = vmatpush1.bf16.msra.mxu1 %v1177_v3  ;;  %v1180_v5 = vld [vmem:[#allocation5 + $0x2c4] ss:$16 sps:$4 sm:$0xff]   ;;  %852 = vmatprep.subr.bf16.mxu0 %v1178_v4  ;;  %v1183_v7 = vld [vmem:[#allocation5 + $0x2c0] ss:$16 sps:$4 sm:$0xff]   ;;  %v59_v52 = vpack.c.bf16 %v55_v50, %v55_v50  ;;  %v1322_v46 = vld [vmem:[#allocation5 + $0x1c8] ss:$16 sps:$4 sm:$0xff]   ;;  %p1429_p2 = scmp.lt.s32.totalorder %s1029_s2, %s1029_s2 }
  0x29   :  { %893 = vmatprep.subr.bf16.mxu1 %v1180_v5  ;;  %v1184_v8 = vld [vmem:[#allocation5 + $0xa4] ss:$16 sps:$4 sm:$0xff]   ;;  %v1188_v10 = vld [vmem:[#allocation5 + $0xa0] ss:$16 sps:$4 sm:$0xff]   ;;  %882 = vmatprep.mubr.bf16.mxu0 %v1485_v49  ;;  %v1328_v50 = vld [vmem:[#allocation5 + $0x1a8] ss:$16 sps:$4 sm:$0xff]  }
  0x2a   :  { %v1186_v9 = vld [vmem:[#allocation5 + $0x2a4] ss:$16 sps:$4 sm:$0xff]   ;;  %v1189_v11 = vld [vmem:[#allocation5 + $0x2a0] ss:$16 sps:$4 sm:$0xff]   ;;  %923 = vmatprep.mubr.bf16.mxu1 %v59_v52  ;;  %s1424_s28 = scalar_lea.vmem %s1029_s2, 512 }
  0x2b   :  { %853 = vmatpush1.bf16.msra.mxu0 %v1182_v6  ;;  %v1190_v12 = vld [vmem:[#allocation5 + $0x84] ss:$16 sps:$4 sm:$0xff]   ;;  %v1194_v14 = vld [vmem:[#allocation5 + $0x80] ss:$16 sps:$4 sm:$0xff]   ;;  %v1270_v6 = vld [vmem:[#allocation5 + $0xec] ss:$16 sps:$4 sm:$0xff]   ;;  %p1425_p1 = scmp.ne.s32.totalorder %s1029_s2, %s1424_s28  ;;  %p1430_p3 = scmp.lt.s32.totalorder %s1424_s28, %s1424_s28 }
  0x2c   :  { %894 = vmatpush1.bf16.msra.mxu1 %v1183_v7  ;;  %854 = vmatprep.subr.bf16.mxu0 %v1184_v8  ;;  %v1192_v13 = vld [vmem:[#allocation5 + $0x284] ss:$16 sps:$4 sm:$0xff]   ;;  %v1195_v15 = vld [vmem:[#allocation5 + $0x280] ss:$16 sps:$4 sm:$0xff]   ;;  %v1273_v7 = vld [vmem:[#allocation5 + $0x2ec] ss:$16 sps:$4 sm:$0xff]  }
  0x2d   :  { %895 = vmatprep.subr.bf16.mxu1 %v1186_v9  ;;  %v1196_v16 = vld [vmem:[#allocation5 + $0x64] ss:$16 sps:$4 sm:$0xff]   ;;  %v1200_v18 = vld [vmem:[#allocation5 + $0x60] ss:$16 sps:$4 sm:$0xff]   ;;  %p1431_p4 = por %p1430_p3, %p1429_p2 }
  0x2e   :  { %v1198_v17 = vld [vmem:[#allocation5 + $0x264] ss:$16 sps:$4 sm:$0xff]   ;;  %v1201_v19 = vld [vmem:[#allocation5 + $0x260] ss:$16 sps:$4 sm:$0xff]  }
  0x2f   :  { %855 = vmatpush1.bf16.msra.mxu0 %v1188_v10  ;;  %v1202_v20 = vld [vmem:[#allocation5 + $0x44] ss:$16 sps:$4 sm:$0xff]   ;;  %v1206_v22 = vld [vmem:[#allocation5 + $0x40] ss:$16 sps:$4 sm:$0xff]   ;;  %v1268_v10 = vld [vmem:[#allocation5 + $0xe8] ss:$16 sps:$4 sm:$0xff]   ;;  %p1432_p5 = pnand %p1431_p4, %p1425_p1 }
  0x30   :  { %896 = vmatpush1.bf16.msra.mxu1 %v1189_v11  ;;  %856 = vmatprep.subr.bf16.mxu0 %v1190_v12  ;;  %v1204_v21 = vld [vmem:[#allocation5 + $0x244] ss:$16 sps:$4 sm:$0xff]   ;;  %v1207_v23 = vld [vmem:[#allocation5 + $0x240] ss:$16 sps:$4 sm:$0xff]   ;;  %v1271_v11 = vld [vmem:[#allocation5 + $0x2e8] ss:$16 sps:$4 sm:$0xff]  }
  0x31   :  { %897 = vmatprep.subr.bf16.mxu1 %v1192_v13  ;;  %v1208_v24 = vld [vmem:[#allocation5 + $0x24] ss:$16 sps:$4 sm:$0xff]   ;;  %v1212_v26 = vld [vmem:[#allocation5 + $0x20] ss:$16 sps:$4 sm:$0xff]   ;;  %v1276_v12 = vld [vmem:[#allocation5 + $0xcc] ss:$16 sps:$4 sm:$0xff]  }
  0x32   :  { %v1210_v25 = vld [vmem:[#allocation5 + $0x224] ss:$16 sps:$4 sm:$0xff]   ;;  %v1213_v27 = vld [vmem:[#allocation5 + $0x220] ss:$16 sps:$4 sm:$0xff]   ;;  %v1279_v13 = vld [vmem:[#allocation5 + $0x2cc] ss:$16 sps:$4 sm:$0xff]  }
  0x33   :  { %857 = vmatpush1.bf16.msra.mxu0 %v1194_v14  ;;  %v1214_v28 = vld [vmem:[#allocation5 + $0x4] ss:$16 sps:$4 sm:$0xff]   ;;  %v1218_v30 = vld [vmem:[#allocation5] ss:$16 sps:$4 sm:$0xff]   ;;  %v1274_v14 = vld [vmem:[#allocation5 + $0xc8] ss:$16 sps:$4 sm:$0xff]  }
  0x34   :  { %898 = vmatpush1.bf16.msra.mxu1 %v1195_v15  ;;  %858 = vmatprep.subr.bf16.mxu0 %v1196_v16  ;;  %v1216_v29 = vld [vmem:[#allocation5 + $0x204] ss:$16 sps:$4 sm:$0xff]   ;;  %v1219_v31 = vld [vmem:[#allocation5 + $0x200] ss:$16 sps:$4 sm:$0xff]   ;;  %v1277_v15 = vld [vmem:[#allocation5 + $0x2c8] ss:$16 sps:$4 sm:$0xff]  }
  0x35   :  { %899 = vmatprep.subr.bf16.mxu1 %v1198_v17  ;;  %v1220_v32 = vld [vmem:[#allocation5 + $0x1e4] ss:$16 sps:$4 sm:$0xff]   ;;  %v1224_v34 = vld [vmem:[#allocation5 + $0x1e0] ss:$16 sps:$4 sm:$0xff]   ;;  %v1282_v16 = vld [vmem:[#allocation5 + $0xac] ss:$16 sps:$4 sm:$0xff]  }
  0x36   :  { %v1222_v33 = vld [vmem:[#allocation5 + $0x3e4] ss:$16 sps:$4 sm:$0xff]   ;;  %v1225_v35 = vld [vmem:[#allocation5 + $0x3e0] ss:$16 sps:$4 sm:$0xff]   ;;  %v1285_v17 = vld [vmem:[#allocation5 + $0x2ac] ss:$16 sps:$4 sm:$0xff]  }
  0x37   :  { %859 = vmatpush1.bf16.msra.mxu0 %v1200_v18  ;;  %v1226_v36 = vld [vmem:[#allocation5 + $0x1c4] ss:$16 sps:$4 sm:$0xff]   ;;  %v1230_v38 = vld [vmem:[#allocation5 + $0x1c0] ss:$16 sps:$4 sm:$0xff]   ;;  %v1280_v18 = vld [vmem:[#allocation5 + $0xa8] ss:$16 sps:$4 sm:$0xff]  }
  0x38   :  { %900 = vmatpush1.bf16.msra.mxu1 %v1201_v19  ;;  %860 = vmatprep.subr.bf16.mxu0 %v1202_v20  ;;  %v1228_v37 = vld [vmem:[#allocation5 + $0x3c4] ss:$16 sps:$4 sm:$0xff]   ;;  %v1231_v39 = vld [vmem:[#allocation5 + $0x3c0] ss:$16 sps:$4 sm:$0xff]   ;;  %v1283_v19 = vld [vmem:[#allocation5 + $0x2a8] ss:$16 sps:$4 sm:$0xff]  }
  0x39   :  { %901 = vmatprep.subr.bf16.mxu1 %v1204_v21  ;;  %v1232_v40 = vld [vmem:[#allocation5 + $0x1a4] ss:$16 sps:$4 sm:$0xff]   ;;  %v1236_v42 = vld [vmem:[#allocation5 + $0x1a0] ss:$16 sps:$4 sm:$0xff]   ;;  %v1288_v20 = vld [vmem:[#allocation5 + $0x8c] ss:$16 sps:$4 sm:$0xff]  }
  0x3a   :  { %v1234_v41 = vld [vmem:[#allocation5 + $0x3a4] ss:$16 sps:$4 sm:$0xff]   ;;  %v1237_v43 = vld [vmem:[#allocation5 + $0x3a0] ss:$16 sps:$4 sm:$0xff]   ;;  %v1291_v21 = vld [vmem:[#allocation5 + $0x28c] ss:$16 sps:$4 sm:$0xff]  }
  0x3b   :  { %861 = vmatpush1.bf16.msra.mxu0 %v1206_v22  ;;  %v1238_v44 = vld [vmem:[#allocation5 + $0x184] ss:$16 sps:$4 sm:$0xff]   ;;  %v1242_v47 = vld [vmem:[#allocation5 + $0x180] ss:$16 sps:$4 sm:$0xff]   ;;  %v1286_v22 = vld [vmem:[#allocation5 + $0x88] ss:$16 sps:$4 sm:$0xff]  }
  0x3c   :  { %902 = vmatpush1.bf16.msra.mxu1 %v1207_v23  ;;  %862 = vmatprep.subr.bf16.mxu0 %v1208_v24  ;;  %v1240_v45 = vld [vmem:[#allocation5 + $0x384] ss:$16 sps:$4 sm:$0xff]   ;;  %v1243_v48 = vld [vmem:[#allocation5 + $0x380] ss:$16 sps:$4 sm:$0xff]   ;;  %v1289_v23 = vld [vmem:[#allocation5 + $0x288] ss:$16 sps:$4 sm:$0xff]  }
  0x3d   :  { %903 = vmatprep.subr.bf16.mxu1 %v1210_v25  ;;  %v1244_v51 = vld [vmem:[#allocation5 + $0x164] ss:$16 sps:$4 sm:$0xff]   ;;  %v1248_v54 = vld [vmem:[#allocation5 + $0x160] ss:$16 sps:$4 sm:$0xff]   ;;  %v1294_v24 = vld [vmem:[#allocation5 + $0x6c] ss:$16 sps:$4 sm:$0xff]  }
  0x3e   :  { %v1246_v53 = vld [vmem:[#allocation5 + $0x364] ss:$16 sps:$4 sm:$0xff]   ;;  %v1249_v55 = vld [vmem:[#allocation5 + $0x360] ss:$16 sps:$4 sm:$0xff]   ;;  %v1297_v25 = vld [vmem:[#allocation5 + $0x26c] ss:$16 sps:$4 sm:$0xff]  }
  0x3f   :  { %863 = vmatpush1.bf16.msra.mxu0 %v1212_v26  ;;  %v1250_v56 = vld [vmem:[#allocation5 + $0x144] ss:$16 sps:$4 sm:$0xff]   ;;  %v1254_v58 = vld [vmem:[#allocation5 + $0x140] ss:$16 sps:$4 sm:$0xff]   ;;  %v1292_v26 = vld [vmem:[#allocation5 + $0x68] ss:$16 sps:$4 sm:$0xff]  }
  0x40   :  { %904 = vmatpush1.bf16.msra.mxu1 %v1213_v27  ;;  %864 = vmatprep.subr.bf16.mxu0 %v1214_v28  ;;  %v1252_v57 = vld [vmem:[#allocation5 + $0x344] ss:$16 sps:$4 sm:$0xff]   ;;  %v1255_v59 = vld [vmem:[#allocation5 + $0x340] ss:$16 sps:$4 sm:$0xff]   ;;  %v1295_v27 = vld [vmem:[#allocation5 + $0x268] ss:$16 sps:$4 sm:$0xff]  }
  0x41   :  { %905 = vmatprep.subr.bf16.mxu1 %v1216_v29  ;;  %v1256_v60 = vld [vmem:[#allocation5 + $0x124] ss:$16 sps:$4 sm:$0xff]   ;;  %v1260_v62 = vld [vmem:[#allocation5 + $0x120] ss:$16 sps:$4 sm:$0xff]   ;;  %v1300_v28 = vld [vmem:[#allocation5 + $0x4c] ss:$16 sps:$4 sm:$0xff]  }
  0x42   :  { %v1258_v61 = vld [vmem:[#allocation5 + $0x324] ss:$16 sps:$4 sm:$0xff]   ;;  %v1261_v63 = vld [vmem:[#allocation5 + $0x320] ss:$16 sps:$4 sm:$0xff]   ;;  %v1303_v29 = vld [vmem:[#allocation5 + $0x24c] ss:$16 sps:$4 sm:$0xff]  }
  0x43   :  { %865 = vmatpush1.bf16.msra.mxu0 %v1218_v30  ;;  %v1262_v0 = vld [vmem:[#allocation5 + $0x104] ss:$16 sps:$4 sm:$0xff]   ;;  %v1266_v2 = vld [vmem:[#allocation5 + $0x100] ss:$16 sps:$4 sm:$0xff]   ;;  %v1298_v30 = vld [vmem:[#allocation5 + $0x48] ss:$16 sps:$4 sm:$0xff]  }
  0x44   :  { %906 = vmatpush1.bf16.msra.mxu1 %v1219_v31  ;;  %866 = vmatprep.subr.bf16.mxu0 %v1220_v32  ;;  %v1264_v1 = vld [vmem:[#allocation5 + $0x304] ss:$16 sps:$4 sm:$0xff]   ;;  %v1267_v3 = vld [vmem:[#allocation5 + $0x300] ss:$16 sps:$4 sm:$0xff]   ;;  %v1301_v31 = vld [vmem:[#allocation5 + $0x248] ss:$16 sps:$4 sm:$0xff]  }
  0x45   :  { %907 = vmatprep.subr.bf16.mxu1 %v1222_v33  ;;  %v52_v4 = vld [vmem:[#allocation2] sm:$0xff]  ;;  %v54_v5 = vld [vmem:[#allocation2 + $0x10] sm:$0xff]  ;;  %v1306_v32 = vld [vmem:[#allocation5 + $0x2c] ss:$16 sps:$4 sm:$0xff]  }
  0x46   :  { %v1488_v8 = vpack.c.bf16 %v52_v4, %v52_v4  ;;  %v1490_v9 = vpack.c.bf16 %v54_v5, %v54_v5  ;;  %v1309_v33 = vld [vmem:[#allocation5 + $0x22c] ss:$16 sps:$4 sm:$0xff]  }
  0x47   :  { %867 = vmatpush2.bf16.msra.mxu0 %v1224_v34  ;;  %v1304_v34 = vld [vmem:[#allocation5 + $0x28] ss:$16 sps:$4 sm:$0xff]   ;;  %v1360_v4 = vld [vmem:[#allocation5 + $0x10c] ss:$16 sps:$4 sm:$0xff]  }
  0x48   :  { %908 = vmatpush2.bf16.msra.mxu1 %v1225_v35  ;;  %868 = vmatprep.subr.bf16.mxu0 %v1226_v36  ;;  %v1307_v35 = vld [vmem:[#allocation5 + $0x228] ss:$16 sps:$4 sm:$0xff]   ;;  %v1312_v36 = vld [vmem:[#allocation5 + $0xc] ss:$16 sps:$4 sm:$0xff]  }
  0x49   :  { %909 = vmatprep.subr.bf16.mxu1 %v1228_v37  ;;  %v1315_v37 = vld [vmem:[#allocation5 + $0x20c] ss:$16 sps:$4 sm:$0xff]  }
  0x4a   :  { %v1363_v5 = vld [vmem:[#allocation5 + $0x30c] ss:$16 sps:$4 sm:$0xff]  }
  0x4b   :  { %869 = vmatpush2.bf16.msra.mxu0 %v1230_v38  ;;  %v1310_v38 = vld [vmem:[#allocation5 + $0x8] ss:$16 sps:$4 sm:$0xff]  }
  0x4c   :  { %910 = vmatpush2.bf16.msra.mxu1 %v1231_v39  ;;  %870 = vmatprep.subr.bf16.mxu0 %v1232_v40  ;;  %v1313_v39 = vld [vmem:[#allocation5 + $0x208] ss:$16 sps:$4 sm:$0xff]   ;;  %v1318_v40 = vld [vmem:[#allocation5 + $0x1ec] ss:$16 sps:$4 sm:$0xff]  }
  0x4d   :  { %911 = vmatprep.subr.bf16.mxu1 %v1234_v41  ;;  %v1321_v41 = vld [vmem:[#allocation5 + $0x3ec] ss:$16 sps:$4 sm:$0xff]  }
  0x4f   :  { %871 = vmatpush2.bf16.msra.mxu0 %v1236_v42  ;;  %v1316_v42 = vld [vmem:[#allocation5 + $0x1e8] ss:$16 sps:$4 sm:$0xff]  }
  0x50   :  { %912 = vmatpush2.bf16.msra.mxu1 %v1237_v43  ;;  %872 = vmatprep.subr.bf16.mxu0 %v1238_v44  ;;  %v1319_v43 = vld [vmem:[#allocation5 + $0x3e8] ss:$16 sps:$4 sm:$0xff]   ;;  %v1324_v44 = vld [vmem:[#allocation5 + $0x1cc] ss:$16 sps:$4 sm:$0xff]  }
  0x51   :  { %913 = vmatprep.subr.bf16.mxu1 %v1240_v45  ;;  %v1327_v45 = vld [vmem:[#allocation5 + $0x3cc] ss:$16 sps:$4 sm:$0xff]  }
  0x53   :  { %873 = vmatpush2.bf16.msra.mxu0 %v1242_v47  ;;  %v1325_v47 = vld [vmem:[#allocation5 + $0x3c8] ss:$16 sps:$4 sm:$0xff]  }
  0x54   :  { %914 = vmatpush2.bf16.msra.mxu1 %v1243_v48  ;;  %874 = vmatprep.subr.bf16.mxu0 %v1244_v51  ;;  %v1330_v48 = vld [vmem:[#allocation5 + $0x1ac] ss:$16 sps:$4 sm:$0xff]   ;;  %v1331_v51 = vld [vmem:[#allocation5 + $0x3a8] ss:$16 sps:$4 sm:$0xff]  }
  0x55   :  { %915 = vmatprep.subr.bf16.mxu1 %v1246_v53  ;;  %v1339_v53 = vld [vmem:[#allocation5 + $0x38c] ss:$16 sps:$4 sm:$0xff]  }
  0x57   :  { %875 = vmatpush2.bf16.msra.mxu0 %v1248_v54  ;;  %v1334_v54 = vld [vmem:[#allocation5 + $0x188] ss:$16 sps:$4 sm:$0xff]  }
  0x58   :  { %916 = vmatpush2.bf16.msra.mxu1 %v1249_v55  ;;  %876 = vmatprep.subr.bf16.mxu0 %v1250_v56  ;;  %v1337_v55 = vld [vmem:[#allocation5 + $0x388] ss:$16 sps:$4 sm:$0xff]   ;;  %v1342_v56 = vld [vmem:[#allocation5 + $0x16c] ss:$16 sps:$4 sm:$0xff]  }
  0x59   :  { %917 = vmatprep.subr.bf16.mxu1 %v1252_v57  ;;  %v1345_v57 = vld [vmem:[#allocation5 + $0x36c] ss:$16 sps:$4 sm:$0xff]  }
  0x5b   :  { %877 = vmatpush2.bf16.msra.mxu0 %v1254_v58  ;;  %v1340_v58 = vld [vmem:[#allocation5 + $0x168] ss:$16 sps:$4 sm:$0xff]  }
  0x5c   :  { %918 = vmatpush2.bf16.msra.mxu1 %v1255_v59  ;;  %878 = vmatprep.subr.bf16.mxu0 %v1256_v60  ;;  %v1343_v59 = vld [vmem:[#allocation5 + $0x368] ss:$16 sps:$4 sm:$0xff]   ;;  %v1348_v60 = vld [vmem:[#allocation5 + $0x14c] ss:$16 sps:$4 sm:$0xff]  }
  0x5d   :  { %919 = vmatprep.subr.bf16.mxu1 %v1258_v61  ;;  %v1351_v61 = vld [vmem:[#allocation5 + $0x34c] ss:$16 sps:$4 sm:$0xff]  }
  0x5f   :  { %879 = vmatpush2.bf16.msra.mxu0 %v1260_v62  ;;  %v1346_v62 = vld [vmem:[#allocation5 + $0x148] ss:$16 sps:$4 sm:$0xff]  }
  0x60   :  { %920 = vmatpush2.bf16.msra.mxu1 %v1261_v63  ;;  %880 = vmatprep.subr.bf16.mxu0 %v1262_v0  ;;  %v1349_v63 = vld [vmem:[#allocation5 + $0x348] ss:$16 sps:$4 sm:$0xff]   ;;  %v1354_v0 = vld [vmem:[#allocation5 + $0x12c] ss:$16 sps:$4 sm:$0xff]  }
  0x61   :  { %921 = vmatprep.subr.bf16.mxu1 %v1264_v1  ;;  %v1357_v1 = vld [vmem:[#allocation5 + $0x32c] ss:$16 sps:$4 sm:$0xff]  }
  0x63   :  { %881 = vmatpush2.bf16.msra.mxu0 %v1266_v2  ;;  %v1352_v2 = vld [vmem:[#allocation5 + $0x128] ss:$16 sps:$4 sm:$0xff]  }
  0x64   :  { %922 = vmatpush2.bf16.msra.mxu1 %v1267_v3  ;;  %932 = vmatprep.subr.bf16.mxu0 %v1270_v6  ;;  %v1355_v3 = vld [vmem:[#allocation5 + $0x328] ss:$16 sps:$4 sm:$0xff]  }
  0x65   :  { %973 = vmatprep.subr.bf16.mxu1 %v1273_v7  ;;  %v1358_v6 = vld [vmem:[#allocation5 + $0x108] ss:$16 sps:$4 sm:$0xff]  }
  0x66   :  { %883 = vmatmul.mubr.bf16.vlgmr.msra.gmra.mxu0 %v1488_v8  ;;  %v1361_v7 = vld [vmem:[#allocation5 + $0x308] ss:$16 sps:$4 sm:$0xff]  }
  0x67   :  { %924 = vmatmul.mubr.bf16.vlgmr.msra.gmra.mxu1 %v1490_v9  ;;  %933 = vmatpush1.bf16.msra.mxu0 %v1268_v10  ;;  %v190_v10 = vlaneseq }
  0x68   :  { %974 = vmatpush1.bf16.msra.mxu1 %v1271_v11  ;;  %934 = vmatprep.subr.bf16.mxu0 %v1276_v12 }
  0x69   :  { %975 = vmatprep.subr.bf16.mxu1 %v1279_v13  ;;  %964 = vmatprep.mubr.bf16.mxu0 %v1485_v49  ;;  %v1333_v49 = vld [vmem:[#allocation5 + $0x3ac] ss:$16 sps:$4 sm:$0xff]   ;;  %v191_v11 = vshrl.u32 %v190_v10, 7  ;;  %v188_v13 = vld [vmem:[#allocation7] sm:$0xf] }
  0x6a   :  { %1005 = vmatprep.mubr.bf16.mxu1 %v59_v52  ;;  %v1336_v52 = vld [vmem:[#allocation5 + $0x18c] ss:$16 sps:$4 sm:$0xff]  }
  0x6b   :  { %935 = vmatpush1.bf16.msra.mxu0 %v1274_v14  ;;  %v192_v12 = vsub.s32 0, %v191_v11  ;;  %v196_v14 = vsub.s32 1, %v191_v11 }
  0x6c   :  { %976 = vmatpush1.bf16.msra.mxu1 %v1277_v15  ;;  %936 = vmatprep.subr.bf16.mxu0 %v1282_v16 }
  0x6d   :  { %977 = vmatprep.subr.bf16.mxu1 %v1285_v17  ;;  %v193_v15 = vrot.slane %v188_v13, %v192_v12  ;;  %v197_v16 = vrot.slane %v188_v13, %v196_v14 }
  0x6f   :  { %937 = vmatpush1.bf16.msra.mxu0 %v1280_v18 }
  0x70   :  { %978 = vmatpush1.bf16.msra.mxu1 %v1283_v19  ;;  %938 = vmatprep.subr.bf16.mxu0 %v1288_v20 }
  0x71   :  { %979 = vmatprep.subr.bf16.mxu1 %v1291_v21 }
  0x73   :  { %939 = vmatpush1.bf16.msra.mxu0 %v1286_v22 }
  0x74   :  { %980 = vmatpush1.bf16.msra.mxu1 %v1289_v23  ;;  %940 = vmatprep.subr.bf16.mxu0 %v1294_v24 }
  0x75   :  { %981 = vmatprep.subr.bf16.mxu1 %v1297_v25 }
  0x77   :  { %941 = vmatpush1.bf16.msra.mxu0 %v1292_v26 }
  0x78   :  { %982 = vmatpush1.bf16.msra.mxu1 %v1295_v27  ;;  %942 = vmatprep.subr.bf16.mxu0 %v1300_v28 }
  0x79   :  { %983 = vmatprep.subr.bf16.mxu1 %v1303_v29  ;;  %v200_v29 = vsub.s32 2, %v191_v11 }
  0x7b   :  { %943 = vmatpush1.bf16.msra.mxu0 %v1298_v30  ;;  %v204_v30 = vsub.s32 3, %v191_v11 }
  0x7c   :  { %984 = vmatpush1.bf16.msra.mxu1 %v1301_v31  ;;  %944 = vmatprep.subr.bf16.mxu0 %v1306_v32  ;;  %v201_v31 = vrot.slane %v188_v13, %v200_v29 }
  0x7d   :  { %985 = vmatprep.subr.bf16.mxu1 %v1309_v33  ;;  %v205_v32 = vrot.slane %v188_v13, %v204_v30 }
  0x7f   :  { %945 = vmatpush1.bf16.msra.mxu0 %v1304_v34 }
  0x80   :  { %986 = vmatpush1.bf16.msra.mxu1 %v1307_v35  ;;  %946 = vmatprep.subr.bf16.mxu0 %v1312_v36 }
  0x81   :  { %987 = vmatprep.subr.bf16.mxu1 %v1315_v37 }
  0x83   :  { %947 = vmatpush1.bf16.msra.mxu0 %v1310_v38 }
  0x84   :  { %988 = vmatpush1.bf16.msra.mxu1 %v1313_v39  ;;  %948 = vmatprep.subr.bf16.mxu0 %v1318_v40 }
  0x85   :  { %989 = vmatprep.subr.bf16.mxu1 %v1321_v41 }
  0x87   :  { %949 = vmatpush2.bf16.msra.mxu0 %v1316_v42 }
  0x88   :  { %990 = vmatpush2.bf16.msra.mxu1 %v1319_v43  ;;  %950 = vmatprep.subr.bf16.mxu0 %v1324_v44 }
  0x89   :  { %991 = vmatprep.subr.bf16.mxu1 %v1327_v45 }
  0x8b   :  { %951 = vmatpush2.bf16.msra.mxu0 %v1322_v46 }
  0x8c   :  { %992 = vmatpush2.bf16.msra.mxu1 %v1325_v47  ;;  %952 = vmatprep.subr.bf16.mxu0 %v1330_v48 }
  0x8d   :  { %993 = vmatprep.subr.bf16.mxu1 %v1333_v49 }
  0x8f   :  { %953 = vmatpush2.bf16.msra.mxu0 %v1328_v50 }
  0x90   :  { %994 = vmatpush2.bf16.msra.mxu1 %v1331_v51  ;;  %954 = vmatprep.subr.bf16.mxu0 %v1336_v52 }
  0x91   :  { %995 = vmatprep.subr.bf16.mxu1 %v1339_v53 }
  0x93   :  { %955 = vmatpush2.bf16.msra.mxu0 %v1334_v54 }
  0x94   :  { %996 = vmatpush2.bf16.msra.mxu1 %v1337_v55  ;;  %956 = vmatprep.subr.bf16.mxu0 %v1342_v56 }
  0x95   :  { %997 = vmatprep.subr.bf16.mxu1 %v1345_v57 }
  0x97   :  { %957 = vmatpush2.bf16.msra.mxu0 %v1340_v58 }
  0x98   :  { %998 = vmatpush2.bf16.msra.mxu1 %v1343_v59  ;;  %958 = vmatprep.subr.bf16.mxu0 %v1348_v60 }
  0x99   :  { %999 = vmatprep.subr.bf16.mxu1 %v1351_v61 }
  0x9b   :  { %959 = vmatpush2.bf16.msra.mxu0 %v1346_v62 }
  0x9c   :  { %1000 = vmatpush2.bf16.msra.mxu1 %v1349_v63  ;;  %960 = vmatprep.subr.bf16.mxu0 %v1354_v0 }
  0x9d   :  { %1001 = vmatprep.subr.bf16.mxu1 %v1357_v1 }
  0x9f   :  { %961 = vmatpush2.bf16.msra.mxu0 %v1352_v2 }
  0xa0   :  { %1002 = vmatpush2.bf16.msra.mxu1 %v1355_v3  ;;  %962 = vmatprep.subr.bf16.mxu0 %v1360_v4 }
  0xa1   :  { %1003 = vmatprep.subr.bf16.mxu1 %v1363_v5 }
  0xa3   :  { %963 = vmatpush2.bf16.msra.mxu0 %v1358_v6 }
  0xa4   :  { %1004 = vmatpush2.bf16.msra.mxu1 %v1361_v7 }
  0xa6   :  { %965 = vmatmul.mubr.bf16.vlgmr.msra.gmra.mxu0 %v1488_v8 }
  0xa7   :  { %1006 = vmatmul.mubr.bf16.vlgmr.msra.gmra.mxu1 %v1490_v9 }
 0x126   :  { %v884_v17 = vpop.f32.mrf.mxu0 }
 0x127   :  { %v925_v18 = vpop.f32.mrf.mxu1  ;;  %v885_v19 = vadd.f32 %v884_v17, %v193_v15 }
 0x128   :  { %v886_v20 = vpop.f32.mrf.mxu0 }
 0x129   :  { %v927_v21 = vpop.f32.mrf.mxu1  ;;  %v926_v22 = vadd.f32 %v925_v18, %v885_v19  ;;  %v887_v23 = vadd.f32 %v886_v20, %v197_v16 }
 0x12a   :  { %v888_v24 = vpop.f32.mrf.mxu0 }
 0x12b   :  { %v929_v25 = vpop.f32.mrf.mxu1  ;;  %v1014_v26 = vmax.f32 %v926_v22, 0.0  ;;  %v928_v8 = vadd.f32 %v927_v21, %v887_v23 }
 0x12c   :  { %v889_v27 = vpop.f32.mrf.mxu0 }
 0x12d   :  { %v930_v9 = vpop.f32.mrf.mxu1  ;;  %1018 = vst [vmem:[#allocation8] sm:$0xff] %v1014_v26  ;;  %v1015_v28 = vmax.f32 %v928_v8, 0.0 }
 0x12f   :  { %1019 = vst [vmem:[#allocation8 + $0x8] sm:$0xff] %v1015_v28 }
 0x166   :  { %v966_v33 = vpop.f32.mrf.mxu0 }
 0x167   :  { %v1007_v34 = vpop.f32.mrf.mxu1  ;;  %v967_v35 = vadd.f32 %v966_v33, %v201_v31 }
 0x168   :  { %v968_v36 = vpop.f32.mrf.mxu0 }
 0x169   :  { %v1009_v37 = vpop.f32.mrf.mxu1  ;;  %v1008_v38 = vadd.f32 %v1007_v34, %v967_v35  ;;  %v969_v39 = vadd.f32 %v968_v36, %v205_v32 }
 0x16a   :  { %v970_v40 = vpop.f32.mrf.mxu0 }
 0x16b   :  { %v1011_v41 = vpop.f32.mrf.mxu1  ;;  %v1016_v42 = vmax.f32 %v1008_v38, 0.0  ;;  %v1010_v43 = vadd.f32 %v1009_v37, %v969_v39 }
 0x16c   :  { %v971_v44 = vpop.f32.mrf.mxu0 }
 0x16d   :  { %v1012_v45 = vpop.f32.mrf.mxu1  ;;  %1020 = vst [vmem:[#allocation8 + $0x10] sm:$0xff] %v1016_v42  ;;  %v1017_v46 = vmax.f32 %v1010_v43, 0.0 }
 0x16f   :  { %1021 = vst [vmem:[#allocation8 + $0x18] sm:$0xff] %v1017_v46 }
 0x170   :  { %1435 = shalt.err (!%p1432_p5)
}
 0x171   :  { %1031 = dma.vmem_to_hbm [thread:$0]  %s1029_s2, 512, %s1503_s3, [#allocation4]  }
 0x172   :  { %1448 = dma.done.wait [#allocation4], 512  }
 0x173   :  { %1449 = vsyncadd [#allocation4], 4294966784 }
 0x174   :  { %1035 = vsyncpa [#allocation3], 1 }
 0x175   :  { %1036 = vsyncpa [#allocation6], 1 }
 0x176   :  { %1037 = vsyncpa [#allocation4], 1 }

</bundles_post_ra>
